<compile_context>
chip_gen: v5e
topology: v5e:2x2
jax: 0.10.0
libtpu: 0.0.40
codegen_flags: <defaults>
</compile_context>

<pallas_src>
import functools

import jax
import jax.numpy as jnp
from jax.experimental import pallas as pl
from jax.experimental.pallas import tpu as pltpu

_LOG_2PI = 1.8378770664093453  # log(2*pi)


def _tile_rows(a, reps):
    """Repeat a (R, C) array along the sublane axis -> (reps*R, C)."""
    return a if reps == 1 else jnp.concatenate([a] * reps, axis=0)


# -----------------------------------------------------------------------------
# Fused kernel: encoder MLP -> rsample -> decoder MLP -> all log-probs.
# Single invocation (no grid); every operand lives fully in VMEM.
# -----------------------------------------------------------------------------
def _probvae_kernel(x_ref, eps_ref,
                    ew1_ref, eb1_ref, ewml_ref, ebml_ref,
                    dw1_ref, db1_ref, dwml_ref, dbml_ref,
                    zpq_ref, logpxz_ref, *, S, Dz, Dx):
    x = x_ref[...]                                   # (B, Dx)  f32
    eps = eps_ref[...]                               # (S*B, Dz) f32

    # ---- encoder MLP (bf16 MXU operands, f32 accumulation) ----
    h = jnp.dot(x.astype(jnp.bfloat16), ew1_ref[...],
                preferred_element_type=jnp.float32) + eb1_ref[...]
    h = jnp.maximum(h, 0.0)                          # ReLU          (B, H)
    ml = jnp.dot(h.astype(jnp.bfloat16), ewml_ref[...],
                 preferred_element_type=jnp.float32) + ebml_ref[...]  # (B, 2*Dz)
    mu_z = ml[:, :Dz]
    lv_z = ml[:, Dz:]
    std_z = jnp.exp(0.5 * lv_z)

    # Broadcast encoder stats over the sample axis: (B, Dz) -> (S*B, Dz).
    mu_t = _tile_rows(mu_z, S)
    std_t = _tile_rows(std_z, S)
    lv_t = _tile_rows(lv_z, S)

    # rsample: z = mu + std * eps
    z = mu_t + std_t * eps

    # log q(z|x): (z - mu)/std == eps, and log(std) == 0.5*logvar.
    log_qz = -0.5 * eps * eps - 0.5 * lv_t - 0.5 * _LOG_2PI
    # log p(z): standard Normal.
    log_pz = -0.5 * z * z - 0.5 * _LOG_2PI

    # ---- decoder MLP over all S*B rows in one batched matmul ----
    hd = jnp.dot(z.astype(jnp.bfloat16), dw1_ref[...],
                 preferred_element_type=jnp.float32) + db1_ref[...]
    hd = jnp.maximum(hd, 0.0)                        # (S*B, H)
    mlx = jnp.dot(hd.astype(jnp.bfloat16), dwml_ref[...],
                  preferred_element_type=jnp.float32) + dbml_ref[...]  # (S*B, 2*Dx)
    mu_x = mlx[:, :Dx]
    lv_x = mlx[:, Dx:]

    # log p(x|z) without materializing std_x or dividing:
    #   -0.5*(x-mu)^2 * exp(-logvar) - 0.5*logvar - 0.5*log(2*pi)
    x_t = _tile_rows(x, S)                           # (S*B, Dx)
    diff = x_t - mu_x
    logpxz_ref[...] = (-0.5 * diff * diff * jnp.exp(-lv_x)
                       - 0.5 * lv_x - 0.5 * _LOG_2PI)

    # Lane-packed (S*B, 3*Dz) output: [ z | log_pz | log_qz_x ].
    zpq_ref[...] = jnp.concatenate([z, log_pz, log_qz], axis=1)


# -----------------------------------------------------------------------------
# Wrapper
# -----------------------------------------------------------------------------
def probvae_forward(x_nchw, params, eps):
    """x_nchw: (B, C, H, W) float32; eps: (S, B, Dz) standard-normal noise."""
    B = x_nchw.shape[0]
    x = x_nchw.reshape(B, -1).astype(jnp.float32)    # (B, Dx)
    Dx = x.shape[1]
    S, _, Dz = eps.shape

    # One-time weight prep (would normally live at param-init time): fuse the
    # (mu, logvar) heads into lane-concatenated weights and cast MXU operands
    # to bf16.  Biases stay f32 (added after f32 accumulation).
    ew1 = params["enc_w1"].astype(jnp.bfloat16)
    ewml = jnp.concatenate([params["enc_wmu"], params["enc_wlv"]],
                           axis=1).astype(jnp.bfloat16)          # (H, 2*Dz)
    ebml = jnp.concatenate([params["enc_bmu"], params["enc_blv"]], axis=1)
    dw1 = params["dec_w1"].astype(jnp.bfloat16)
    dwml = jnp.concatenate([params["dec_wmu"], params["dec_wlv"]],
                           axis=1).astype(jnp.bfloat16)          # (H, 2*Dx)
    dbml = jnp.concatenate([params["dec_bmu"], params["dec_blv"]], axis=1)

    eps2d = eps.reshape(S * B, Dz)

    vmem = lambda: pl.BlockSpec(memory_space=pltpu.MemorySpace.VMEM)
    kernel = functools.partial(_probvae_kernel, S=S, Dz=Dz, Dx=Dx)

    # Single fused call, no grid (whole problem fits comfortably in VMEM on
    # v5e/v6e/v7x at these sizes; retile with a batch grid if B/H/Dx grow).
    zpq, log_px_z = pl.pallas_call(
        kernel,
        out_shape=(jax.ShapeDtypeStruct((S * B, 3 * Dz), jnp.float32),
                   jax.ShapeDtypeStruct((S * B, Dx), jnp.float32)),
        in_specs=[vmem() for _ in range(10)],
        out_specs=(vmem(), vmem()),
    )(x, eps2d, ew1, params["enc_b1"], ewml, ebml,
      dw1, params["dec_b1"], dwml, dbml)

    z = zpq[:, 0:Dz].reshape(S, B, Dz)
    log_pz = zpq[:, Dz:2 * Dz].reshape(S, B, Dz)
    log_qz_x = zpq[:, 2 * Dz:3 * Dz].reshape(S, B, Dz)

    return {
        "x": x,
        "z": z,
        "log_px_z": log_px_z.reshape(S, B, Dx),
        "log_pz": log_pz,
        "log_qz_x": log_qz_x,
        # TODO(synk): 'vae', 'px_z_dist', 'qz_x_dist' entries are Python
        # distribution/module objects in torch; not representable as arrays.
    }


def _init_params(key, Dx, H, Dz):
    ks = jax.random.split(key, 10)
    n = lambda k, shp, scale: (scale * jax.random.normal(k, shp)).astype(jnp.float32)
    return {
        "enc_w1":  n(ks[0], (Dx, H), 0.05),
        "enc_b1":  jnp.zeros((1, H), jnp.float32),
        "enc_wmu": n(ks[1], (H, Dz), 0.05),
        "enc_bmu": jnp.zeros((1, Dz), jnp.float32),
        "enc_wlv": n(ks[2], (H, Dz), 0.05),
        "enc_blv": jnp.zeros((1, Dz), jnp.float32),
        "dec_w1":  n(ks[3], (Dz, H), 0.05),
        "dec_b1":  jnp.zeros((1, H), jnp.float32),
        "dec_wmu": n(ks[4], (H, Dx), 0.05),
        "dec_bmu": jnp.zeros((1, Dx), jnp.float32),
        "dec_wlv": n(ks[5], (H, Dx), 0.05),
        "dec_blv": jnp.zeros((1, Dx), jnp.float32),
    }


if __name__ == "__main__":
    key = jax.random.PRNGKey(0)
    B, C, Hh, Ww = 2, 4, 16, 16          # NCHW input, flattened to (B, 1024)
    Dx = C * Hh * Ww
    Hid, Dz, S = 64, 32, 2

    k_x, k_p, k_eps = jax.random.split(key, 3)
    x = jax.random.normal(k_x, (B, C, Hh, Ww), dtype=jnp.float32)
    params = _init_params(k_p, Dx, Hid, Dz)
    eps = jax.random.normal(k_eps, (S, B, Dz), dtype=jnp.float32)

    out = probvae_forward(x, params, eps)
    jax.block_until_ready(out)

    # ---- reference in plain JAX (same bf16-operand / f32-accumulate matmuls,
    #      written in the original torch.distributions.Normal form) ----
    bf = jnp.bfloat16
    mm = lambda a, w: jnp.dot(a.astype(bf), w.astype(bf),
                              preferred_element_type=jnp.float32)
    xf = x.reshape(B, -1)
    h = jnp.maximum(mm(xf, params["enc_w1"]) + params["enc_b1"], 0.0)
    mu = mm(h, params["enc_wmu"]) + params["enc_bmu"]
    lv = mm(h, params["enc_wlv"]) + params["enc_blv"]
    std = jnp.exp(0.5 * lv)
    z_ref = mu[None] + std[None] * eps                               # (S,B,Dz)
    log_qz_ref = (-0.5 * jnp.square((z_ref - mu[None]) / std[None])
                  - jnp.log(std)[None] - 0.5 * _LOG_2PI)
    log_pz_ref = -0.5 * jnp.square(z_ref) - 0.5 * _LOG_2PI

    hd = jnp.maximum(mm(z_ref.reshape(S * B, Dz), params["dec_w1"])
                     + params["dec_b1"], 0.0)
    mu_x = mm(hd, params["dec_wmu"]) + params["dec_bmu"]
    lv_x = mm(hd, params["dec_wlv"]) + params["dec_blv"]
    std_x = jnp.exp(0.5 * lv_x)
    xt = jnp.tile(xf, (S, 1))
    log_px_ref = (-0.5 * jnp.square((xt - mu_x) / std_x)
                  - jnp.log(std_x) - 0.5 * _LOG_2PI).reshape(S, B, Dx)

    assert out["z"].shape == (S, B, Dz)
    assert out["log_px_z"].shape == (S, B, Dx)
    assert out["log_pz"].shape == (S, B, Dz)
    assert out["log_qz_x"].shape == (S, B, Dz)
    assert jnp.allclose(out["z"], z_ref, atol=1e-4, rtol=1e-4)
    assert jnp.allclose(out["log_pz"], log_pz_ref, atol=1e-4, rtol=1e-4)
    assert jnp.allclose(out["log_qz_x"], log_qz_ref, atol=1e-4, rtol=1e-4)
    assert jnp.allclose(out["log_px_z"], log_px_ref, atol=5e-3, rtol=5e-3)

    print("KERNEL_OK")
</pallas_src>

<mosaic_0001>
module attributes {stable_mosaic.version = 11 : i64} {
  func.func @_probvae_kernel(%arg0: memref<2x1024xf32, #tpu.memory_space<vmem>>, %arg1: memref<4x32xf32, #tpu.memory_space<vmem>>, %arg2: memref<1024x64xbf16, #tpu.memory_space<vmem>>, %arg3: memref<1x64xf32, #tpu.memory_space<vmem>>, %arg4: memref<64x64xbf16, #tpu.memory_space<vmem>>, %arg5: memref<1x64xf32, #tpu.memory_space<vmem>>, %arg6: memref<32x64xbf16, #tpu.memory_space<vmem>>, %arg7: memref<1x64xf32, #tpu.memory_space<vmem>>, %arg8: memref<64x2048xbf16, #tpu.memory_space<vmem>>, %arg9: memref<1x2048xf32, #tpu.memory_space<vmem>>, %arg10: memref<4x96xf32, #tpu.memory_space<vmem>>, %arg11: memref<4x1024xf32, #tpu.memory_space<vmem>>) attributes {dimension_semantics = [], scalar_prefetch = 0 : i64, scratch_operands = 0 : i64, tpu.core_type = #tpu.core_type<tc>} {
    %c0 = arith.constant 0 : index
    %c0_0 = arith.constant 0 : index
    %0 = vector.load %arg0[%c0, %c0_0] : memref<2x1024xf32, #tpu.memory_space<vmem>>, vector<2x1024xf32>
    %c0_1 = arith.constant 0 : index
    %c0_2 = arith.constant 0 : index
    %1 = vector.load %arg1[%c0_1, %c0_2] : memref<4x32xf32, #tpu.memory_space<vmem>>, vector<4x32xf32>
    %2 = arith.truncf %0 : vector<2x1024xf32> to vector<2x1024xbf16>
    %c0_3 = arith.constant 0 : index
    %c0_4 = arith.constant 0 : index
    %3 = vector.load %arg2[%c0_3, %c0_4] : memref<1024x64xbf16, #tpu.memory_space<vmem>>, vector<1024x64xbf16>
    %cst = arith.constant dense<0.000000e+00> : vector<2x64xf32>
    %4 = tpu.matmul %2, %3, %cst {dimension_numbers = #tpu.dot_dimension_numbers<[1], [0], [0], [1], [0, 0, 1, 1], [], []>} : vector<2x1024xbf16>, vector<1024x64xbf16>, vector<2x64xf32> -> vector<2x64xf32>
    %c0_5 = arith.constant 0 : index
    %c0_6 = arith.constant 0 : index
    %5 = vector.load %arg3[%c0_5, %c0_6] : memref<1x64xf32, #tpu.memory_space<vmem>>, vector<1x64xf32>
    %6 = vector.broadcast %5 : vector<1x64xf32> to vector<2x64xf32>
    %7 = arith.addf %4, %6 : vector<2x64xf32>
    %cst_7 = arith.constant 0.000000e+00 : f32
    %8 = vector.broadcast %cst_7 : f32 to vector<2x64xf32>
    %9 = arith.maximumf %7, %8 : vector<2x64xf32>
    %10 = arith.truncf %9 : vector<2x64xf32> to vector<2x64xbf16>
    %c0_8 = arith.constant 0 : index
    %c0_9 = arith.constant 0 : index
    %11 = vector.load %arg4[%c0_8, %c0_9] : memref<64x64xbf16, #tpu.memory_space<vmem>>, vector<64x64xbf16>
    %cst_10 = arith.constant dense<0.000000e+00> : vector<2x64xf32>
    %12 = tpu.matmul %10, %11, %cst_10 {dimension_numbers = #tpu.dot_dimension_numbers<[1], [0], [0], [1], [0, 0, 1, 1], [], []>} : vector<2x64xbf16>, vector<64x64xbf16>, vector<2x64xf32> -> vector<2x64xf32>
    %c0_11 = arith.constant 0 : index
    %c0_12 = arith.constant 0 : index
    %13 = vector.load %arg5[%c0_11, %c0_12] : memref<1x64xf32, #tpu.memory_space<vmem>>, vector<1x64xf32>
    %14 = vector.broadcast %13 : vector<1x64xf32> to vector<2x64xf32>
    %15 = arith.addf %12, %14 : vector<2x64xf32>
    %16 = vector.extract_strided_slice %15 {offsets = [0, 0], sizes = [2, 32], strides = [1, 1]} : vector<2x64xf32> to vector<2x32xf32>
    %17 = vector.extract_strided_slice %15 {offsets = [0, 32], sizes = [2, 32], strides = [1, 1]} : vector<2x64xf32> to vector<2x32xf32>
    %cst_13 = arith.constant 5.000000e-01 : f32
    %18 = vector.broadcast %cst_13 : f32 to vector<2x32xf32>
    %19 = arith.mulf %18, %17 : vector<2x32xf32>
    %20 = math.exp %19 : vector<2x32xf32>
    %21 = tpu.concatenate %16, %16 in 0 : vector<2x32xf32>, vector<2x32xf32> -> vector<4x32xf32>
    %22 = tpu.concatenate %20, %20 in 0 : vector<2x32xf32>, vector<2x32xf32> -> vector<4x32xf32>
    %23 = tpu.concatenate %17, %17 in 0 : vector<2x32xf32>, vector<2x32xf32> -> vector<4x32xf32>
    %24 = arith.mulf %22, %1 : vector<4x32xf32>
    %25 = arith.addf %21, %24 : vector<4x32xf32>
    %cst_14 = arith.constant -5.000000e-01 : f32
    %26 = vector.broadcast %cst_14 : f32 to vector<4x32xf32>
    %27 = arith.mulf %26, %1 : vector<4x32xf32>
    %28 = arith.mulf %27, %1 : vector<4x32xf32>
    %cst_15 = arith.constant 5.000000e-01 : f32
    %29 = vector.broadcast %cst_15 : f32 to vector<4x32xf32>
    %30 = arith.mulf %29, %23 : vector<4x32xf32>
    %31 = arith.subf %28, %30 : vector<4x32xf32>
    %cst_16 = arith.constant 0.918938517 : f32
    %32 = vector.broadcast %cst_16 : f32 to vector<4x32xf32>
    %33 = arith.subf %31, %32 : vector<4x32xf32>
    %cst_17 = arith.constant -5.000000e-01 : f32
    %34 = vector.broadcast %cst_17 : f32 to vector<4x32xf32>
    %35 = arith.mulf %34, %25 : vector<4x32xf32>
    %36 = arith.mulf %35, %25 : vector<4x32xf32>
    %cst_18 = arith.constant 0.918938517 : f32
    %37 = vector.broadcast %cst_18 : f32 to vector<4x32xf32>
    %38 = arith.subf %36, %37 : vector<4x32xf32>
    %39 = arith.truncf %25 : vector<4x32xf32> to vector<4x32xbf16>
    %c0_19 = arith.constant 0 : index
    %c0_20 = arith.constant 0 : index
    %40 = vector.load %arg6[%c0_19, %c0_20] : memref<32x64xbf16, #tpu.memory_space<vmem>>, vector<32x64xbf16>
    %cst_21 = arith.constant dense<0.000000e+00> : vector<4x64xf32>
    %41 = tpu.matmul %39, %40, %cst_21 {dimension_numbers = #tpu.dot_dimension_numbers<[1], [0], [0], [1], [0, 0, 1, 1], [], []>} : vector<4x32xbf16>, vector<32x64xbf16>, vector<4x64xf32> -> vector<4x64xf32>
    %c0_22 = arith.constant 0 : index
    %c0_23 = arith.constant 0 : index
    %42 = vector.load %arg7[%c0_22, %c0_23] : memref<1x64xf32, #tpu.memory_space<vmem>>, vector<1x64xf32>
    %43 = vector.broadcast %42 : vector<1x64xf32> to vector<4x64xf32>
    %44 = arith.addf %41, %43 : vector<4x64xf32>
    %cst_24 = arith.constant 0.000000e+00 : f32
    %45 = vector.broadcast %cst_24 : f32 to vector<4x64xf32>
    %46 = arith.maximumf %44, %45 : vector<4x64xf32>
    %47 = arith.truncf %46 : vector<4x64xf32> to vector<4x64xbf16>
    %c0_25 = arith.constant 0 : index
    %c0_26 = arith.constant 0 : index
    %48 = vector.load %arg8[%c0_25, %c0_26] : memref<64x2048xbf16, #tpu.memory_space<vmem>>, vector<64x2048xbf16>
    %cst_27 = arith.constant dense<0.000000e+00> : vector<4x2048xf32>
    %49 = tpu.matmul %47, %48, %cst_27 {dimension_numbers = #tpu.dot_dimension_numbers<[1], [0], [0], [1], [0, 0, 1, 1], [], []>} : vector<4x64xbf16>, vector<64x2048xbf16>, vector<4x2048xf32> -> vector<4x2048xf32>
    %c0_28 = arith.constant 0 : index
    %c0_29 = arith.constant 0 : index
    %50 = vector.load %arg9[%c0_28, %c0_29] : memref<1x2048xf32, #tpu.memory_space<vmem>>, vector<1x2048xf32>
    %51 = vector.broadcast %50 : vector<1x2048xf32> to vector<4x2048xf32>
    %52 = arith.addf %49, %51 : vector<4x2048xf32>
    %53 = vector.extract_strided_slice %52 {offsets = [0, 0], sizes = [4, 1024], strides = [1, 1]} : vector<4x2048xf32> to vector<4x1024xf32>
    %54 = vector.extract_strided_slice %52 {offsets = [0, 1024], sizes = [4, 1024], strides = [1, 1]} : vector<4x2048xf32> to vector<4x1024xf32>
    %55 = tpu.concatenate %0, %0 in 0 : vector<2x1024xf32>, vector<2x1024xf32> -> vector<4x1024xf32>
    %56 = arith.subf %55, %53 : vector<4x1024xf32>
    %cst_30 = arith.constant -5.000000e-01 : f32
    %57 = vector.broadcast %cst_30 : f32 to vector<4x1024xf32>
    %58 = arith.mulf %57, %56 : vector<4x1024xf32>
    %59 = arith.mulf %58, %56 : vector<4x1024xf32>
    %cst_31 = arith.constant 0.000000e+00 : f32
    %60 = vector.broadcast %cst_31 : f32 to vector<4x1024xf32>
    %61 = arith.subf %60, %54 : vector<4x1024xf32>
    %62 = math.exp %61 : vector<4x1024xf32>
    %63 = arith.mulf %59, %62 : vector<4x1024xf32>
    %cst_32 = arith.constant 5.000000e-01 : f32
    %64 = vector.broadcast %cst_32 : f32 to vector<4x1024xf32>
    %65 = arith.mulf %64, %54 : vector<4x1024xf32>
    %66 = arith.subf %63, %65 : vector<4x1024xf32>
    %cst_33 = arith.constant 0.918938517 : f32
    %67 = vector.broadcast %cst_33 : f32 to vector<4x1024xf32>
    %68 = arith.subf %66, %67 : vector<4x1024xf32>
    %c0_34 = arith.constant 0 : index
    %c0_35 = arith.constant 0 : index
    %69 = vector.load %arg11[%c0_34, %c0_35] : memref<4x1024xf32, #tpu.memory_space<vmem>>, vector<4x1024xf32>
    tpu.vector_store %arg11[%c0_34, %c0_35], %68 {strides = array<i32>} : memref<4x1024xf32, #tpu.memory_space<vmem>>, vector<4x1024xf32>,
    %70 = tpu.concatenate %25, %38, %33 in 1 : vector<4x32xf32>, vector<4x32xf32>, vector<4x32xf32> -> vector<4x96xf32>
    %c0_36 = arith.constant 0 : index
    %c0_37 = arith.constant 0 : index
    %71 = vector.load %arg10[%c0_36, %c0_37] : memref<4x96xf32, #tpu.memory_space<vmem>>, vector<4x96xf32>
    tpu.vector_store %arg10[%c0_36, %c0_37], %70 {strides = array<i32>} : memref<4x96xf32, #tpu.memory_space<vmem>>, vector<4x96xf32>,
    return
  }
}

</mosaic_0001>

<bundles_post_ra>
// kernel: tpu_custom_call.1
= control target key start
LH: loop header
LB: loop body
LE: loop exit
PB: predicated region body
PF: predicated region fallthrough
CT: control target
= control target key end

     0   :  { %17 = vsyncpa [#allocation3], 0  ;;  %s3248_s0 = inlined_call_operand.vmem [shape: f32[2,1024], index: 0, kind: input, shape index: {}]   ;;  %s3249_s1 = inlined_call_operand.vmem [shape: f32[4,32], index: 1, kind: input, shape index: {}]   ;;  %s3250_s2 = inlined_call_operand.vmem [shape: bf16[1024,64], index: 2, kind: input, shape index: {}]   ;;  %s3251_s3 = inlined_call_operand.vmem [shape: f32[1,64], index: 3, kind: input, shape index: {}]   ;;  %s3252_s4 = inlined_call_operand.vmem [shape: bf16[64,64], index: 4, kind: input, shape index: {}]   ;;  %s3253_s5 = inlined_call_operand.vmem [shape: f32[1,64], index: 5, kind: input, shape index: {}]   ;;  %s3254_s6 = inlined_call_operand.vmem [shape: bf16[32,64], index: 6, kind: input, shape index: {}]   ;;  %s3255_s7 = inlined_call_operand.vmem [shape: f32[1,64], index: 7, kind: input, shape index: {}]   ;;  %s3256_s8 = inlined_call_operand.vmem [shape: bf16[64,2048], index: 8, kind: input, shape index: {}]   ;;  %s3257_s9 = inlined_call_operand.vmem [shape: f32[1,2048], index: 9, kind: input, shape index: {}]   ;;  %s3258_s10 = inlined_call_operand.hbm [shape: f32[4,96], index: 10, kind: output, shape index: {0}]   ;;  %s3259_s11 = inlined_call_operand.hbm [shape: f32[4,1024], index: 11, kind: output, shape index: {1}]  }
   0x1   :  { %v2219_v0 = vld [vmem:[%s3250_s2 + $0x38] sm:$0xff]  ;;  %v2218_v4 = vld [vmem:[%s3250_s2 + $0x30] sm:$0xff]  ;;  %v2217_v8 = vld [vmem:[%s3250_s2 + $0x28] sm:$0xff] }
   0x2   :  { %v2227_v1 = vld [vmem:[%s3250_s2 + $0x78] sm:$0xff]  ;;  %588 = vmatpush.bf16.msra.mxu0 %v2219_v0  ;;  %v2226_v5 = vld [vmem:[%s3250_s2 + $0x70] sm:$0xff]  ;;  %v2225_v9 = vld [vmem:[%s3250_s2 + $0x68] sm:$0xff] }
   0x3   :  { %v2235_v2 = vld [vmem:[%s3250_s2 + $0xb8] sm:$0xff]  ;;  %601 = vmatpush.bf16.msra.mxu1 %v2227_v1  ;;  %v2234_v6 = vld [vmem:[%s3250_s2 + $0xb0] sm:$0xff]  ;;  %v2233_v10 = vld [vmem:[%s3250_s2 + $0xa8] sm:$0xff] }
   0x4   :  { %v2243_v3 = vld [vmem:[%s3250_s2 + $0xf8] sm:$0xff]  ;;  %614 = vmatpush.bf16.msra.mxu2 %v2235_v2  ;;  %v2242_v7 = vld [vmem:[%s3250_s2 + $0xf0] sm:$0xff]  ;;  %v2241_v11 = vld [vmem:[%s3250_s2 + $0xe8] sm:$0xff] }
   0x5   :  { %627 = vmatpush.bf16.msra.mxu3 %v2243_v3  ;;  %v2216_v12 = vld [vmem:[%s3250_s2 + $0x20] sm:$0xff]  ;;  %v2215_v17 = vld [vmem:[%s3250_s2 + $0x18] sm:$0xff]  ;;  %v2214_v21 = vld [vmem:[%s3250_s2 + $0x10] sm:$0xff] }
   0x6   :  { %589 = vmatpush.bf16.msra.mxu0 %v2218_v4  ;;  %v2224_v13 = vld [vmem:[%s3250_s2 + $0x60] sm:$0xff]  ;;  %v2223_v18 = vld [vmem:[%s3250_s2 + $0x58] sm:$0xff]  ;;  %v2222_v22 = vld [vmem:[%s3250_s2 + $0x50] sm:$0xff] }
   0x7   :  { %602 = vmatpush.bf16.msra.mxu1 %v2226_v5  ;;  %v2232_v14 = vld [vmem:[%s3250_s2 + $0xa0] sm:$0xff]  ;;  %v2231_v19 = vld [vmem:[%s3250_s2 + $0x98] sm:$0xff]  ;;  %v2230_v23 = vld [vmem:[%s3250_s2 + $0x90] sm:$0xff] }
   0x8   :  { %615 = vmatpush.bf16.msra.mxu2 %v2234_v6  ;;  %v2240_v15 = vld [vmem:[%s3250_s2 + $0xe0] sm:$0xff]  ;;  %v2239_v20 = vld [vmem:[%s3250_s2 + $0xd8] sm:$0xff]  ;;  %v2238_v24 = vld [vmem:[%s3250_s2 + $0xd0] sm:$0xff] }
   0x9   :  { %628 = vmatpush.bf16.msra.mxu3 %v2242_v7  ;;  %v2540_v16 = vld [vmem:[%s3248_s0] sm:$0xff]  ;;  %v2213_v25 = vld [vmem:[%s3250_s2 + $0x8] sm:$0xff] }
   0xa   :  { %590 = vmatpush.bf16.msra.mxu0 %v2217_v8  ;;  %45 = vst [vmem:[#allocation1] ss:$4 sm:$0xff] %v2540_v16  ;;  %v2221_v26 = vld [vmem:[%s3250_s2 + $0x48] sm:$0xff] }
   0xb   :  { %603 = vmatpush.bf16.msra.mxu1 %v2225_v9 }
   0xc   :  { %616 = vmatpush.bf16.msra.mxu2 %v2233_v10 }
   0xd   :  { %629 = vmatpush.bf16.msra.mxu3 %v2241_v11 }
   0xe   :  { %591 = vmatpush.bf16.msra.mxu0 %v2216_v12 }
   0xf   :  { %604 = vmatpush.bf16.msra.mxu1 %v2224_v13 }
  0x10   :  { %617 = vmatpush.bf16.msra.mxu2 %v2232_v14 }
  0x11   :  { %630 = vmatpush.bf16.msra.mxu3 %v2240_v15 }
  0x12   :  { %592 = vmatpush.bf16.msra.mxu0 %v2215_v17 }
  0x13   :  { %605 = vmatpush.bf16.msra.mxu1 %v2223_v18 }
  0x14   :  { %618 = vmatpush.bf16.msra.mxu2 %v2231_v19 }
  0x15   :  { %631 = vmatpush.bf16.msra.mxu3 %v2239_v20 }
  0x16   :  { %18 = vsyncpa [#allocation5], 0  ;;  %v50_v27 = vld.sshfl [vmem:[#allocation1 + $0x10] sm:$0xff pattern:$0x73625140]  ;;  %593 = vmatpush.bf16.msra.mxu0 %v2214_v21  ;;  %v2229_v31 = vld [vmem:[%s3250_s2 + $0x88] sm:$0xff] }
  0x17   :  { %v48_v28 = vld.sshfl [vmem:[#allocation1] sm:$0xff pattern:$0x73625140]  ;;  %606 = vmatpush.bf16.msra.mxu1 %v2222_v22  ;;  %v51_v29 = vld.sshfl [vmem:[#allocation1 + $0x18] sm:$0xff pattern:$0x73625140]  ;;  %v66_v43 = vpack.c.bf16 %v50_v27, %v50_v27 }
  0x18   :  { %v49_v30 = vld.sshfl [vmem:[#allocation1 + $0x8] sm:$0xff pattern:$0x73625140]  ;;  %619 = vmatpush.bf16.msra.mxu2 %v2230_v23  ;;  %v2212_v34 = vld [vmem:[%s3250_s2] sm:$0xff]  ;;  %v2251_v38 = vld [vmem:[%s3250_s2 + $0x138] sm:$0xff]  ;;  %v64_v44 = vpack.c.bf16 %v48_v28, %v48_v28  ;;  %v67_v48 = vpack.c.bf16 %v51_v29, %v51_v29  ;;  %s2424_s23 = smov 32  }
  0x19   :  { %632 = vmatpush.bf16.msra.mxu3 %v2238_v24  ;;  %v2237_v32 = vld [vmem:[%s3250_s2 + $0xc8] sm:$0xff]  ;;  %1452 = vst [vmem:[#allocation1] ss:$4 sm:$0xff] %v2540_v16  ;;  %v2220_v35 = vld [vmem:[%s3250_s2 + $0x40] sm:$0xff]  ;;  %v2259_v39 = vld [vmem:[%s3250_s2 + $0x178] sm:$0xff]  ;;  %v65_v49 = vpack.c.bf16 %v49_v30, %v49_v30  ;;  %vm730_vm0 = vcmask 523264  }
  0x1a   :  { %v2583_v33 = vld [vmem:[%s3248_s0 + $0x8] sm:$0xff]  ;;  %594 = vmatpush.bf16.msra.mxu0 %v2213_v25  ;;  %v2228_v36 = vld [vmem:[%s3250_s2 + $0x80] sm:$0xff]  ;;  %v2267_v40 = vld [vmem:[%s3250_s2 + $0x1b8] sm:$0xff]  ;;  %vm753_vm1 = vcmask 1041408   ;;  %s2425_s25 = smov 96   ;;  %s2426_s26 = smov 64  }
  0x1b   :  { %47 = vst [vmem:[#allocation1 + $0x20] ss:$4 sm:$0xff] %v2583_v33  ;;  %607 = vmatpush.bf16.msra.mxu1 %v2221_v26  ;;  %v2236_v37 = vld [vmem:[%s3250_s2 + $0xc0] sm:$0xff]  ;;  %v2275_v41 = vld [vmem:[%s3250_s2 + $0x1f8] sm:$0xff]  ;;  %v2250_v42 = vld [vmem:[%s3250_s2 + $0x130] sm:$0xff]  ;;  %vm802_vm2 = vcmask 261120  }
  0x1c   :  { %620 = vmatpush.bf16.msra.mxu2 %v2229_v31  ;;  %v2258_v45 = vld [vmem:[%s3250_s2 + $0x170] sm:$0xff]  ;;  %v2249_v54 = vld [vmem:[%s3250_s2 + $0x128] sm:$0xff]  ;;  %v2248_v58 = vld [vmem:[%s3250_s2 + $0x120] sm:$0xff]  ;;  %vm1614_vm3 = vcmask 781312   ;;  %s2427_s24 = smov [#allocation2]   ;;  %vm1591_vm4 = vcmask 1043456  }
  0x1d   :  { %633 = vmatpush.bf16.msra.mxu3 %v2237_v32  ;;  %v2266_v46 = vld [vmem:[%s3250_s2 + $0x1b0] sm:$0xff]  ;;  %v2257_v55 = vld [vmem:[%s3250_s2 + $0x168] sm:$0xff]  ;;  %v2256_v59 = vld [vmem:[%s3250_s2 + $0x160] sm:$0xff]  ;;  %s1634_s29 = sshll.u32 %s3259_s11, 4  ;;  %s1635_s29 = int_to_ptr.hbm [resolvable:$true] %s1634_s29 }
  0x1e   :  { %595 = vmatpush.bf16.msra.mxu0 %v2212_v34  ;;  %v2274_v47 = vld [vmem:[%s3250_s2 + $0x1f0] sm:$0xff]  ;;  %v2265_v56 = vld [vmem:[%s3250_s2 + $0x1a8] sm:$0xff]  ;;  %v2264_v60 = vld [vmem:[%s3250_s2 + $0x1a0] sm:$0xff] }
  0x1f   :  { %608 = vmatpush.bf16.msra.mxu1 %v2220_v35  ;;  %v2273_v57 = vld [vmem:[%s3250_s2 + $0x1e8] sm:$0xff]  ;;  %v2272_v61 = vld [vmem:[%s3250_s2 + $0x1e0] sm:$0xff]  ;;  %v2247_v62 = vld [vmem:[%s3250_s2 + $0x118] sm:$0xff] }
  0x20   :  { %621 = vmatpush.bf16.msra.mxu2 %v2228_v36  ;;  %v2255_v63 = vld [vmem:[%s3250_s2 + $0x158] sm:$0xff]  ;;  %v2246_v2 = vld [vmem:[%s3250_s2 + $0x110] sm:$0xff]  ;;  %v2245_v6 = vld [vmem:[%s3250_s2 + $0x108] sm:$0xff] }
  0x21   :  { %634 = vmatpush.bf16.msra.mxu3 %v2236_v37  ;;  %596 = vmatmul.bf16.vlgmr.msra.gmra.mxu0 %v64_v44  ;;  %v2263_v0 = vld [vmem:[%s3250_s2 + $0x198] sm:$0xff]  ;;  %v2254_v3 = vld [vmem:[%s3250_s2 + $0x150] sm:$0xff]  ;;  %v2253_v7 = vld [vmem:[%s3250_s2 + $0x148] sm:$0xff] }
  0x22   :  { %640 = vmatpush.bf16.msrb.mxu0 %v2251_v38  ;;  %v2622_v50 = vld.sshfl [vmem:[#allocation1 + $0x20] sm:$0xff pattern:$0x73625140]  ;;  %v2624_v51 = vld.sshfl [vmem:[#allocation1 + $0x28] sm:$0xff pattern:$0x73625140]  ;;  %609 = vmatmul.bf16.vlgmr.msra.gmra.mxu1 %v65_v49 }
  0x23   :  { %653 = vmatpush.bf16.msrb.mxu1 %v2259_v39  ;;  %v2626_v52 = vld.sshfl [vmem:[#allocation1 + $0x30] sm:$0xff pattern:$0x73625140]  ;;  %v2628_v53 = vld.sshfl [vmem:[#allocation1 + $0x38] sm:$0xff pattern:$0x73625140]  ;;  %622 = vmatmul.bf16.vlgmr.msra.gmra.mxu2 %v66_v43  ;;  %v68_v14 = vpack.c.bf16 %v2622_v50, %v2622_v50  ;;  %v69_v15 = vpack.c.bf16 %v2624_v51, %v2624_v51 }
  0x24   :  { %666 = vmatpush.bf16.msrb.mxu2 %v2267_v40  ;;  %1454 = vst [vmem:[#allocation1 + $0x20] ss:$4 sm:$0xff] %v2583_v33  ;;  %635 = vmatmul.bf16.vlgmr.msra.gmra.mxu3 %v67_v48  ;;  %v2271_v1 = vld [vmem:[%s3250_s2 + $0x1d8] sm:$0xff]  ;;  %v2262_v4 = vld [vmem:[%s3250_s2 + $0x190] sm:$0xff]  ;;  %v2261_v8 = vld [vmem:[%s3250_s2 + $0x188] sm:$0xff]  ;;  %v70_v17 = vpack.c.bf16 %v2626_v52, %v2626_v52  ;;  %v71_v18 = vpack.c.bf16 %v2628_v53, %v2628_v53 }
  0x25   :  { %679 = vmatpush.bf16.msrb.mxu3 %v2275_v41  ;;  %v2270_v5 = vld [vmem:[%s3250_s2 + $0x1d0] sm:$0xff]  ;;  %v2269_v9 = vld [vmem:[%s3250_s2 + $0x1c8] sm:$0xff]  ;;  %v2244_v10 = vld [vmem:[%s3250_s2 + $0x100] sm:$0xff] }
  0x26   :  { %641 = vmatpush.bf16.msrb.mxu0 %v2250_v42  ;;  %v2252_v11 = vld [vmem:[%s3250_s2 + $0x140] sm:$0xff]  ;;  %v2279_v19 = vld [vmem:[%s3252_s4 + $0x18] sm:$0xff]  ;;  %v2278_v21 = vld [vmem:[%s3252_s4 + $0x10] sm:$0xff] }
  0x27   :  { %654 = vmatpush.bf16.msrb.mxu1 %v2258_v45  ;;  %v2260_v12 = vld [vmem:[%s3250_s2 + $0x180] sm:$0xff]  ;;  %v2277_v23 = vld [vmem:[%s3252_s4 + $0x8] sm:$0xff] }
  0x28   :  { %667 = vmatpush.bf16.msrb.mxu2 %v2266_v46  ;;  %v2268_v13 = vld [vmem:[%s3250_s2 + $0x1c0] sm:$0xff]  ;;  %v2281_v52 = vld [vmem:[%s3254_s6 + $0x8] sm:$0xff] }
  0x29   :  { %680 = vmatpush.bf16.msrb.mxu3 %v2274_v47  ;;  %v2276_v27 = vld [vmem:[%s3252_s4] sm:$0xff]  ;;  %s1623_s4 = sshll.u32 %s3258_s10, 4  ;;  %s1624_s4 = int_to_ptr.hbm [resolvable:$true] %s1623_s4 }
  0x2a   :  { %642 = vmatpush.bf16.msrb.mxu0 %v2249_v54  ;;  %v2351_v29 = vld [vmem:[%s3251_s3] ss:$0 sm:$0xff] }
  0x2b   :  { %655 = vmatpush.bf16.msrb.mxu1 %v2257_v55  ;;  %v42_v30 = vld [vmem:[%s3249_s1] sm:$0xf] }
  0x2c   :  { %668 = vmatpush.bf16.msrb.mxu2 %v2265_v56  ;;  %760 = vrot.lane.b32.xlu0 %v42_v30, %s2424_s23  ;;  %v2352_v53 = vld [vmem:[%s3253_s5] ss:$0 sm:$0xff] }
  0x2d   :  { %681 = vmatpush.bf16.msrb.mxu3 %v2273_v57 }
  0x2e   :  { %643 = vmatpush.bf16.msrb.mxu0 %v2248_v58 }
  0x2f   :  { %656 = vmatpush.bf16.msrb.mxu1 %v2256_v59 }
  0x30   :  { %669 = vmatpush.bf16.msrb.mxu2 %v2264_v60 }
  0x31   :  { %682 = vmatpush.bf16.msrb.mxu3 %v2272_v61 }
  0x32   :  { %644 = vmatpush.bf16.msrb.mxu0 %v2247_v62 }
  0x33   :  { %657 = vmatpush.bf16.msrb.mxu1 %v2255_v63 }
  0x34   :  { %670 = vmatpush.bf16.msrb.mxu2 %v2263_v0 }
  0x35   :  { %683 = vmatpush.bf16.msrb.mxu3 %v2271_v1 }
  0x36   :  { %645 = vmatpush.bf16.msrb.mxu0 %v2246_v2 }
  0x37   :  { %658 = vmatpush.bf16.msrb.mxu1 %v2254_v3  ;;  %v2280_v3 = vld [vmem:[%s3254_s6] sm:$0xff] }
  0x38   :  { %671 = vmatpush.bf16.msrb.mxu2 %v2262_v4  ;;  %v769_v4 = vmul.f32 -0.5, %v42_v30 }
  0x39   :  { %684 = vmatpush.bf16.msrb.mxu3 %v2270_v5 }
  0x3a   :  { %646 = vmatpush.bf16.msrb.mxu0 %v2245_v6  ;;  %v770_v5 = vmul.f32 %v769_v4, %v42_v30  ;;  %v2062_v30 = vld [vmem:[%s3256_s8 + $0x100] sm:$0xf] }
  0x3b   :  { %659 = vmatpush.bf16.msrb.mxu1 %v2253_v7 }
  0x3c   :  { %672 = vmatpush.bf16.msrb.mxu2 %v2261_v8 }
  0x3d   :  { %685 = vmatpush.bf16.msrb.mxu3 %v2269_v9 }
  0x3e   :  { %647 = vmatpush.bf16.msrb.mxu0 %v2244_v10 }
  0x3f   :  { %660 = vmatpush.bf16.msrb.mxu1 %v2252_v11 }
  0x40   :  { %673 = vmatpush.bf16.msrb.mxu2 %v2260_v12 }
  0x41   :  { %686 = vmatpush.bf16.msrb.mxu3 %v2268_v13  ;;  %648 = vmatmul.bf16.vlgmr.msrb.gmra.mxu0 %v68_v14 }
  0x42   :  { %661 = vmatmul.bf16.vlgmr.msrb.gmra.mxu1 %v69_v15  ;;  %738 = vmatpush.bf16.msra.mxu0 %v2279_v19  ;;  %v2330_v15 = vld [vmem:[%s3256_s8 + $0x184] sm:$0xf] }
  0x43   :  { %674 = vmatmul.bf16.vlgmr.msrb.gmra.mxu2 %v70_v17  ;;  %812 = vmatpush.bf16.msra.mxu1 %v2281_v52  ;;  %v2128_v17 = vld [vmem:[%s3256_s8 + $0x1c0] sm:$0xf0] }
  0x44   :  { %687 = vmatmul.bf16.vlgmr.msrb.gmra.mxu3 %v71_v18  ;;  %v2126_v18 = vld [vmem:[%s3256_s8 + $0x180] sm:$0xf]  ;;  %v2131_v19 = vor.u32 %v2330_v15, %v2128_v17  ;;  %v2080_v15 = vld [vmem:[%s3256_s8 + $0x150] sm:$0xf0]  ;;  %v2078_v17 = vld [vmem:[%s3256_s8 + $0x110] sm:$0xf] }
  0x46   :  { %739 = vmatpush.bf16.msra.mxu0 %v2278_v21  ;;  %v2134_v21 = vld [vmem:[%s3256_s8 + $0x188] sm:$0xf]  ;;  %1261 = vmatpush.bf16.msra.mxu3 %v2131_v19 }
  0x47   :  { %813 = vmatpush.bf16.msra.mxu1 %v2280_v3  ;;  %v2142_v3 = vld [vmem:[%s3256_s8 + $0x190] sm:$0xf] }
  0x4a   :  { %740 = vmatpush.bf16.msra.mxu0 %v2277_v23 }
  0x4e   :  { %741 = vmatpush.bf16.msra.mxu0 %v2276_v27 }
  0x9e   :  { %v597_v20 = vpop.f32.mrf.mxu0  ;;  %v761_v63 = vpop.permute.xlu0 %760 }
  0x9f   :  { %v610_v22 = vpop.f32.mrf.mxu1  ;;  %v598_v34 = vadd.f32 %v2351_v29, %v597_v20  ;;  %v2338_v20 = vld [vmem:[%s3256_s8 + $0x1bc] sm:$0xf0]  ;;  %v2064_v29 = vld [vmem:[%s3256_s8 + $0x140] sm:$0xf0] }
  0xa0   :  { %v2127_v23 = vor.u32 %v2338_v20, %v2126_v18  ;;  %v2324_v18 = vld [vmem:[%s3256_s8 + $0x14c] sm:$0xf0] }
  0xa1   :  { %v611_v35 = vadd.f32 %v610_v22, %v598_v34  ;;  %v2339_v22 = vld [vmem:[%s3256_s8 + $0x1c4] sm:$0xf0]  ;;  %v2079_v20 = vor.u32 %v2324_v18, %v2078_v17  ;;  %v2104_v17 = vld [vmem:[%s3256_s8 + $0x168] sm:$0xf0] }
  0xa2   :  { %1248 = vmatpush.bf16.msra.mxu2 %v2127_v23  ;;  %v2070_v34 = vld [vmem:[%s3256_s8 + $0x108] sm:$0xf]  ;;  %v2317_v23 = vld [vmem:[%s3256_s8 + $0x11c] sm:$0xf] }
  0xa6   :  { %v623_v24 = vpop.f32.mrf.mxu2  ;;  %v599_v26 = vpop.f32.mrf.mxu0 }
  0xa7   :  { %v636_v25 = vpop.f32.mrf.mxu3  ;;  %v612_v28 = vpop.f32.mrf.mxu1  ;;  %v624_v36 = vadd.f32 %v623_v24, %v611_v35  ;;  %v2135_v24 = vor.u32 %v2339_v22, %v2134_v21  ;;  %v2136_v26 = vld [vmem:[%s3256_s8 + $0x1c8] sm:$0xf0]  ;;  %v2323_v35 = vld [vmem:[%s3256_s8 + $0x144] sm:$0xf0]  ;;  %v2086_v21 = vld [vmem:[%s3256_s8 + $0x118] sm:$0xf] }
  0xa8   :  { %v2314_v28 = vld [vmem:[%s3256_s8 + $0x104] sm:$0xf]  ;;  %v2325_v22 = vld [vmem:[%s3256_s8 + $0x154] sm:$0xf0] }
  0xa9   :  { %v637_v37 = vadd.f32 %v636_v25, %v624_v36  ;;  %v2331_v25 = vld [vmem:[%s3256_s8 + $0x18c] sm:$0xf]  ;;  %1274 = vmatpush.bf16.msrb.mxu0 %v2135_v24  ;;  %v2087_v24 = vor.u32 %v2325_v22, %v2086_v21  ;;  %v2302_v21 = vld [vmem:[%s3256_s8 + $0xa4] sm:$0xf] }
  0xaa   :  { %v2139_v27 = vor.u32 %v2331_v25, %v2136_v26  ;;  %v2088_v25 = vld [vmem:[%s3256_s8 + $0x158] sm:$0xf0]  ;;  %v2300_v26 = vld [vmem:[%s3256_s8 + $0x94] sm:$0xf]  ;;  %v2032_v22 = vld [vmem:[%s3256_s8 + $0xe0] sm:$0xf0] }
  0xac   :  { %1287 = vmatpush.bf16.msrb.mxu1 %v2139_v27  ;;  %v2016_v27 = vld [vmem:[%s3256_s8 + $0xd0] sm:$0xf0] }
  0xae   :  { %v625_v31 = vpop.f32.mrf.mxu2 }
  0xaf   :  { %v638_v32 = vpop.f32.mrf.mxu3  ;;  %v2067_v31 = vor.u32 %v2314_v28, %v2064_v29  ;;  %v2091_v28 = vor.u32 %v2317_v23, %v2088_v25  ;;  %v2014_v29 = vld [vmem:[%s3256_s8 + $0x90] sm:$0xf]  ;;  %v2030_v25 = vld [vmem:[%s3256_s8 + $0xa0] sm:$0xf] }
  0xb0   :  { %v2322_v32 = vld [vmem:[%s3256_s8 + $0x13c] sm:$0xf0] }
  0xb1   :  { %v2063_v36 = vor.u32 %v2322_v32, %v2062_v30  ;;  %1262 = vmatpush.bf16.msra.mxu3 %v2067_v31  ;;  %v2308_v30 = vld [vmem:[%s3256_s8 + $0xcc] sm:$0xf0]  ;;  %v2022_v31 = vld [vmem:[%s3256_s8 + $0x98] sm:$0xf]  ;;  %v2019_v32 = vor.u32 %v2300_v26, %v2016_v27  ;;  %v2310_v26 = vld [vmem:[%s3256_s8 + $0xdc] sm:$0xf0] }
  0xb2   :  { %v2038_v27 = vld [vmem:[%s3256_s8 + $0xa8] sm:$0xf] }
  0xb3   :  { %1249 = vmatpush.bf16.msra.mxu2 %v2063_v36  ;;  %v2024_v36 = vld [vmem:[%s3256_s8 + $0xd8] sm:$0xf0] }
  0xbe   :  { %v649_v38 = vpop.f32.mrf.mxu0 }
  0xbf   :  { %v662_v39 = vpop.f32.mrf.mxu1  ;;  %v650_v40 = vadd.f32 %v649_v38, %v637_v37  ;;  %v2071_v37 = vor.u32 %v2323_v35, %v2070_v34  ;;  %v2315_v38 = vld [vmem:[%s3256_s8 + $0x10c] sm:$0xf]  ;;  %v2309_v34 = vld [vmem:[%s3256_s8 + $0xd4] sm:$0xf0]  ;;  %v2301_v35 = vld [vmem:[%s3256_s8 + $0x9c] sm:$0xf] }
  0xc1   :  { %v663_v41 = vadd.f32 %v662_v39, %v650_v40  ;;  %v2072_v39 = vld [vmem:[%s3256_s8 + $0x148] sm:$0xf0]  ;;  %v2298_v40 = vld [vmem:[%s3256_s8 + $0x84] sm:$0xf]  ;;  %1275 = vmatpush.bf16.msrb.mxu0 %v2071_v37  ;;  %v2015_v37 = vor.u32 %v2308_v30, %v2014_v29 }
  0xc2   :  { %v2303_v29 = vld [vmem:[%s3256_s8 + $0xac] sm:$0xf] }
  0xc3   :  { %v2040_v30 = vld [vmem:[%s3256_s8 + $0xe8] sm:$0xf0] }
  0xc6   :  { %v675_v42 = vpop.f32.mrf.mxu2  ;;  %v651_v45 = vpop.f32.mrf.mxu0 }
  0xc7   :  { %v688_v43 = vpop.f32.mrf.mxu3  ;;  %v676_v44 = vadd.f32 %v675_v42, %v663_v41  ;;  %v664_v46 = vpop.f32.mrf.mxu1  ;;  %v2075_v41 = vor.u32 %v2315_v38, %v2072_v39  ;;  %v2000_v42 = vld [vmem:[%s3256_s8 + $0xc0] sm:$0xf0]  ;;  %v2306_v45 = vld [vmem:[%s3256_s8 + $0xbc] sm:$0xf0]  ;;  %v2023_v38 = vor.u32 %v2309_v34, %v2022_v31  ;;  %v2284_v39 = vld [vmem:[%s3256_s8 + $0x14] sm:$0xf]  ;;  %v2035_v31 = vor.u32 %v2302_v21, %v2032_v22 }
  0xc8   :  { %v2006_v46 = vld [vmem:[%s3256_s8 + $0x88] sm:$0xf]  ;;  %v2286_v34 = vld [vmem:[%s3256_s8 + $0x24] sm:$0xf]  ;;  %v1984_v21 = vld [vmem:[%s3256_s8 + $0x70] sm:$0xf0] }
  0xc9   :  { %v689_v47 = vadd.f32 %v688_v43, %v676_v44  ;;  %v2003_v43 = vor.u32 %v2298_v40, %v2000_v42  ;;  %v1998_v44 = vld [vmem:[%s3256_s8 + $0x80] sm:$0xf]  ;;  %1288 = vmatpush.bf16.msrb.mxu1 %v2075_v41  ;;  %v1952_v40 = vld [vmem:[%s3256_s8 + $0x50] sm:$0xf0]  ;;  %v1950_v41 = vld [vmem:[%s3256_s8 + $0x10] sm:$0xf]  ;;  %v2027_v42 = vor.u32 %v2301_v35, %v2024_v36 }
  0xca   :  { %v1968_v35 = vld [vmem:[%s3256_s8 + $0x60] sm:$0xf0] }
  0xcb   :  { %v692_v48 = vmax.f32 %v689_v47, 0.0  ;;  %v1999_v47 = vor.u32 %v2306_v45, %v1998_v44  ;;  %1263 = vmatpush.bf16.msra.mxu3 %v2003_v43  ;;  %v2292_v43 = vld [vmem:[%s3256_s8 + $0x4c] sm:$0xf0]  ;;  %v1958_v44 = vld [vmem:[%s3256_s8 + $0x18] sm:$0xf] }
  0xcc   :  { %v2293_v45 = vld [vmem:[%s3256_s8 + $0x54] sm:$0xf0] }
  0xcd   :  { %v693_v49 = vpack.c.bf16 %v692_v48, %v692_v48  ;;  %v2307_v48 = vld [vmem:[%s3256_s8 + $0xc4] sm:$0xf0]  ;;  %1250 = vmatpush.bf16.msra.mxu2 %v1999_v47  ;;  %v1960_v47 = vld [vmem:[%s3256_s8 + $0x58] sm:$0xf0] }
  0xce   :  { %v677_v50 = vpop.f32.mrf.mxu2 }
  0xcf   :  { %v690_v51 = vpop.f32.mrf.mxu3  ;;  %1920 = vmatmul.msk.bf16.vlgmr.msra.gmra.mxu0 %vm730_vm0, %v693_v49  ;;  %v2299_v49 = vld [vmem:[%s3256_s8 + $0x8c] sm:$0xf] }
  0xd0   :  { %v2008_v50 = vld [vmem:[%s3256_s8 + $0xc8] sm:$0xf0]  ;;  %v2007_v51 = vor.u32 %v2307_v48, %v2006_v46  ;;  %v2285_v46 = vld [vmem:[%s3256_s8 + $0x1c] sm:$0xf]  ;;  %v1955_v48 = vor.u32 %v2284_v39, %v1952_v40  ;;  %v2294_v39 = vld [vmem:[%s3256_s8 + $0x5c] sm:$0xf0] }
  0xd1   :  { %v2011_v52 = vor.u32 %v2299_v49, %v2008_v50  ;;  %v1951_v49 = vor.u32 %v2292_v43, %v1950_v41  ;;  %v1959_v50 = vor.u32 %v2293_v45, %v1958_v44  ;;  %v1974_v40 = vld [vmem:[%s3256_s8 + $0x28] sm:$0xf]  ;;  %v1976_v43 = vld [vmem:[%s3256_s8 + $0x68] sm:$0xf0]  ;;  %v1971_v44 = vor.u32 %v2286_v34, %v1968_v35 }
  0xd2   :  { %1276 = vmatpush.bf16.msrb.mxu0 %v2007_v51  ;;  %v1963_v51 = vor.u32 %v2285_v46, %v1960_v47  ;;  %v2295_v41 = vld [vmem:[%s3256_s8 + $0x64] sm:$0xf0]  ;;  %v2336_v46 = vld [vmem:[%s3256_s8 + $0x1b4] sm:$0xf] }
  0xd3   :  { %1289 = vmatpush.bf16.msrb.mxu1 %v2011_v52  ;;  %v2176_v47 = vld [vmem:[%s3256_s8 + $0x1f0] sm:$0xf0]  ;;  %v1455_v35 = vld.sshfl [vmem:[#allocation1] sm:$0xff pattern:$0x73625140] }
 0x14c   :  { %v743_v54 = vpop.f32.mrf.mxu0 }
 0x14d   :  { %v744_v55 = vadd.f32 %v2352_v53, %v743_v54  ;;  %v2282_v53 = vld [vmem:[%s3256_s8 + $0x4] sm:$0xf] }
 0x14e   :  { %v1936_v54 = vld [vmem:[%s3256_s8 + $0x40] sm:$0xf0] }
 0x14f   :  { %v747_v56 = vmul.f32 0.5, %v744_v55  ;;  %v751_v57 = vrot.slane %v744_v55, 6 }
 0x151   :  { %v748_v58 = vmul.f32 1.442695, %v747_v56  ;;  %v754_v59 = vsel %vm753_vm1, %v744_v55, %v751_v57  ;;  %v1934_v55 = vld [vmem:[%s3256_s8] sm:$0xf]  ;;  %v1939_v56 = vor.u32 %v2282_v53, %v1936_v54 }
 0x152   :  { %v771_v60 = vmul.f32 0.5, %v754_v59  ;;  %v2290_v57 = vld [vmem:[%s3256_s8 + $0x3c] sm:$0xf0] }
 0x153   :  { %2354 = vpow2.f32 %v748_v58  ;;  %v1942_v58 = vld [vmem:[%s3256_s8 + $0x8] sm:$0xf]  ;;  %1264 = vmatpush.bf16.msra.mxu3 %v1939_v56 }
 0x154   :  { %v745_v61 = vpop.f32.mrf.mxu0  ;;  %773 = vrot.lane.b32.xlu1 %v771_v60, %s2425_s25  ;;  %v1935_v60 = vor.u32 %v2290_v57, %v1934_v55  ;;  %v2353_v55 = vld [vmem:[%s3255_s7] ss:$0 sm:$0xff] }
 0x156   :  { %1251 = vmatpush.bf16.msra.mxu2 %v1935_v60  ;;  %v2160_v60 = vld [vmem:[%s3256_s8 + $0x1e0] sm:$0xf0] }
 0x159   :  { %v2355_v62 = vpop.eup %2354 }
 0x15a   :  { %v756_v0 = vrot.slane %v2355_v62, 6 }
 0x15c   :  { %v758_v1 = vsel %vm753_vm1, %v2355_v62, %v756_v0  ;;  %v2283_v62 = vld [vmem:[%s3256_s8 + $0xc] sm:$0xf] }
 0x15d   :  { %v763_v2 = vmul.f32 %v761_v63, %v758_v1  ;;  %v1944_v63 = vld [vmem:[%s3256_s8 + $0x48] sm:$0xf0]  ;;  %v2332_v1 = vld [vmem:[%s3256_s8 + $0x194] sm:$0xf] }
 0x15e   :  { %v1947_v0 = vor.u32 %v2283_v62, %v1944_v63  ;;  %v2166_v62 = vld [vmem:[%s3256_s8 + $0x1a8] sm:$0xf] }
 0x15f   :  { %765 = vrot.lane.b32.xlu0 %v763_v2, %s2425_s25  ;;  %v2144_v2 = vld [vmem:[%s3256_s8 + $0x1d0] sm:$0xf0]  ;;  %v2343_v63 = vld [vmem:[%s3256_s8 + $0x1e4] sm:$0xf0]  ;;  %s1621_s25 = sshll.u32 %s2427_s24, 4  ;;  %s1622_s25 = int_to_ptr.vmem [resolvable:$true] %s1621_s25 }
 0x160   :  { %1290 = vmatpush.bf16.msrb.mxu1 %v1947_v0  ;;  %v2147_v4 = vor.u32 %v2332_v1, %v2144_v2  ;;  %v2335_v1 = vld [vmem:[%s3256_s8 + $0x1ac] sm:$0xf] }
 0x161   :  { %v2168_v2 = vld [vmem:[%s3256_s8 + $0x1e8] sm:$0xf0] }
 0x162   :  { %1313 = vmatpush.bf16.msrb.mxu3 %v2147_v4 }
 0x1c6   :  { %v774_v6 = vpop.permute.xlu1 %773 }
 0x1c7   :  { %v776_v7 = vsub.f32 %v770_v5, %v774_v6  ;;  %v2340_v5 = vld [vmem:[%s3256_s8 + $0x1cc] sm:$0xf0]  ;;  %v2150_v6 = vld [vmem:[%s3256_s8 + $0x198] sm:$0xf] }
 0x1c9   :  { %v1921_v8 = vadd.f32 -0.9189385, %v776_v7  ;;  %v2341_v7 = vld [vmem:[%s3256_s8 + $0x1d4] sm:$0xf0] }
 0x1cb   :  { %1609 = vrot.lane.b32.xlu2 %v1921_v8, %s2426_s26  ;;  %v2143_v8 = vor.u32 %v2340_v5, %v2142_v3 }
 0x1cd   :  { %1300 = vmatpush.bf16.msrb.mxu2 %v2143_v8  ;;  %v2167_v8 = vor.u32 %v2343_v63, %v2166_v62  ;;  %v2328_v62 = vld [vmem:[%s3256_s8 + $0x16c] sm:$0xf0]  ;;  %v2118_v63 = vld [vmem:[%s3256_s8 + $0x138] sm:$0xf] }
 0x1d1   :  { %v766_v9 = vpop.permute.xlu0 %765  ;;  %1301 = vmatpush.bf16.msrb.mxu2 %v2079_v20 }
 0x1d2   :  { %v2742_v10 = vadd.f32 %v766_v9, %v754_v59  ;;  %v2291_v59 = vld [vmem:[%s3256_s8 + $0x44] sm:$0xf0]  ;;  %v2151_v9 = vor.u32 %v2341_v7, %v2150_v6  ;;  %v2318_v6 = vld [vmem:[%s3256_s8 + $0x124] sm:$0xf] }
 0x1d3   :  { %v1943_v61 = vor.u32 %v2291_v59, %v1942_v58  ;;  %v2334_v59 = vld [vmem:[%s3256_s8 + $0x1a4] sm:$0xf] }
 0x1d4   :  { %v781_v11 = vpack.c.bf16 %v2742_v10, %v2742_v10  ;;  %v778_v12 = vmul.f32 -0.5, %v2742_v10  ;;  %v2163_v4 = vor.u32 %v2334_v59, %v2160_v60  ;;  %v2096_v7 = vld [vmem:[%s3256_s8 + $0x160] sm:$0xf0]  ;;  %v2112_v59 = vld [vmem:[%s3256_s8 + $0x170] sm:$0xf0] }
 0x1d5   :  { %1277 = vmatpush.bf16.msrb.mxu0 %v1943_v61  ;;  %1302 = vmatpush.bf16.msrb.mxu2 %v2015_v37  ;;  %v2342_v61 = vld [vmem:[%s3256_s8 + $0x1dc] sm:$0xf0]  ;;  %v2043_v37 = vor.u32 %v2303_v29, %v2040_v30  ;;  %v1992_v29 = vld [vmem:[%s3256_s8 + $0x78] sm:$0xf0] }
 0x1d6   :  { %1931 = vmatmul.msk.bf16.vlgmr.msra.gmra.mxu1 %vm802_vm2, %v781_v11  ;;  %v779_v13 = vmul.f32 %v778_v12, %v2742_v10  ;;  %v2333_v11 = vld [vmem:[%s3256_s8 + $0x19c] sm:$0xf] }
 0x1d7   :  { %v2152_v12 = vld [vmem:[%s3256_s8 + $0x1d8] sm:$0xf0] }
 0x1d8   :  { %v1922_v14 = vadd.f32 -0.9189385, %v779_v13  ;;  %v2316_v13 = vld [vmem:[%s3256_s8 + $0x114] sm:$0xf] }
 0x1d9   :  { %1326 = vmatpush.bf16.msra.mxu0 %v2151_v9  ;;  %v2083_v19 = vor.u32 %v2316_v13, %v2080_v15  ;;  %1303 = vmatpush.bf16.msrb.mxu2 %v1951_v49  ;;  %v2171_v9 = vor.u32 %v2335_v1, %v2168_v2  ;;  %v2102_v13 = vld [vmem:[%s3256_s8 + $0x128] sm:$0xf]  ;;  %v2319_v15 = vld [vmem:[%s3256_s8 + $0x12c] sm:$0xf]  ;;  %v2321_v1 = vld [vmem:[%s3256_s8 + $0x13c] sm:$0xf] }
 0x1da   :  { %1605 = vrot.lane.b32.xlu1 %v1922_v14, %s2424_s23  ;;  %v2155_v14 = vor.u32 %v2333_v11, %v2152_v12  ;;  %v2094_v11 = vld [vmem:[%s3256_s8 + $0x120] sm:$0xf]  ;;  %v2120_v2 = vld [vmem:[%s3256_s8 + $0x178] sm:$0xf0] }
 0x1db   :  { %1314 = vmatpush.bf16.msrb.mxu3 %v2083_v19  ;;  %v2326_v12 = vld [vmem:[%s3256_s8 + $0x15c] sm:$0xf0]  ;;  %v2099_v19 = vor.u32 %v2318_v6, %v2096_v7  ;;  %v2304_v6 = vld [vmem:[%s3256_s8 + $0xb4] sm:$0xf] }
 0x1dc   :  { %1339 = vmatpush.bf16.msra.mxu1 %v2155_v14  ;;  %v2327_v14 = vld [vmem:[%s3256_s8 + $0x164] sm:$0xf0]  ;;  %v2095_v20 = vor.u32 %v2326_v12, %v2094_v11  ;;  %v2048_v7 = vld [vmem:[%s3256_s8 + $0xf0] sm:$0xf0]  ;;  %v2046_v11 = vld [vmem:[%s3256_s8 + $0xb0] sm:$0xf] }
 0x1dd   :  { %1327 = vmatpush.bf16.msra.mxu0 %v2087_v24  ;;  %v2103_v23 = vor.u32 %v2327_v14, %v2102_v13  ;;  %v2107_v24 = vor.u32 %v2319_v15, %v2104_v17  ;;  %v2312_v12 = vld [vmem:[%s3256_s8 + $0xec] sm:$0xf0]  ;;  %v2054_v13 = vld [vmem:[%s3256_s8 + $0xb8] sm:$0xf]  ;;  %v2305_v15 = vld [vmem:[%s3256_s8 + $0xbc] sm:$0xf] }
 0x1de   :  { %v2313_v14 = vld [vmem:[%s3256_s8 + $0xf4] sm:$0xf0]  ;;  %v2056_v17 = vld [vmem:[%s3256_s8 + $0xf8] sm:$0xf0] }
 0x1df   :  { %1315 = vmatpush.bf16.msrb.mxu3 %v2019_v32  ;;  %v2031_v32 = vor.u32 %v2310_v26, %v2030_v25  ;;  %v2055_v22 = vor.u32 %v2313_v14, %v2054_v13  ;;  %v2296_v25 = vld [vmem:[%s3256_s8 + $0x6c] sm:$0xf0]  ;;  %v1990_v26 = vld [vmem:[%s3256_s8 + $0x38] sm:$0xf] }
 0x1e0   :  { %1340 = vmatpush.bf16.msra.mxu1 %v2091_v28  ;;  %v2311_v28 = vld [vmem:[%s3256_s8 + $0xe4] sm:$0xf0] }
 0x1e1   :  { %1328 = vmatpush.bf16.msra.mxu0 %v2023_v38  ;;  %v2039_v36 = vor.u32 %v2311_v28, %v2038_v27  ;;  %v1966_v38 = vld [vmem:[%s3256_s8 + $0x20] sm:$0xf]  ;;  %v2297_v27 = vld [vmem:[%s3256_s8 + $0x74] sm:$0xf0]  ;;  %v2289_v28 = vld [vmem:[%s3256_s8 + $0x3c] sm:$0xf] }
 0x1e2   :  { %v1967_v45 = vor.u32 %v2294_v39, %v1966_v38  ;;  %v1995_v34 = vor.u32 %v2289_v28, %v1992_v29  ;;  %v1457_v38 = vld.sshfl [vmem:[#allocation1 + $0x10] sm:$0xff pattern:$0x73625140]  ;;  %v3178_v39 = vld.sshfl [vmem:[#allocation1 + $0x20] sm:$0xff pattern:$0x73625140] }
 0x1e3   :  { %1316 = vmatpush.bf16.msrb.mxu3 %v1955_v48  ;;  %v1975_v48 = vor.u32 %v2295_v41, %v1974_v40  ;;  %v3180_v40 = vld.sshfl [vmem:[#allocation1 + $0x28] sm:$0xff pattern:$0x73625140]  ;;  %v3184_v41 = vld.sshfl [vmem:[#allocation1 + $0x38] sm:$0xff pattern:$0x73625140] }
 0x1e4   :  { %1341 = vmatpush.bf16.msra.mxu1 %v2027_v42  ;;  %v2287_v42 = vld [vmem:[%s3256_s8 + $0x2c] sm:$0xf] }
 0x1e5   :  { %1329 = vmatpush.bf16.msra.mxu0 %v1959_v50  ;;  %v1979_v49 = vor.u32 %v2287_v42, %v1976_v43  ;;  %v2174_v50 = vld [vmem:[%s3256_s8 + $0x1b0] sm:$0xf] }
 0x1e8   :  { %1342 = vmatpush.bf16.msra.mxu1 %v1963_v51  ;;  %v2344_v51 = vld [vmem:[%s3256_s8 + $0x1ec] sm:$0xf0] }
 0x225   :  { %v1610_v54 = vpop.permute.xlu2 %1609 }
 0x24c   :  { %v1606_v52 = vpop.permute.xlu1 %1605 }
 0x24d   :  { %v1612_v53 = vsel %vm802_vm2, %v2742_v10, %v1606_v52  ;;  %v2158_v10 = vld [vmem:[%s3256_s8 + $0x1a0] sm:$0xf]  ;;  %v2182_v52 = vld [vmem:[%s3256_s8 + $0x1b8] sm:$0xf] }
 0x24e   :  { %v1613_v56 = vsel %vm730_vm0, %v1612_v53, %v1610_v54  ;;  %v2159_v5 = vor.u32 %v2342_v61, %v2158_v10  ;;  %v2345_v53 = vld [vmem:[%s3256_s8 + $0x1f4] sm:$0xf0]  ;;  %v2337_v54 = vld [vmem:[%s3256_s8 + $0x1bc] sm:$0xf]  ;;  %v2110_v61 = vld [vmem:[%s3256_s8 + $0x130] sm:$0xf] }
 0x24f   :  { %1615 = vst.msk [vmem:[#allocation2] sm:$0xf] %vm1614_vm3, %v1613_v56  ;;  %v2179_v56 = vor.u32 %v2336_v46, %v2176_v47  ;;  %v2183_v60 = vor.u32 %v2345_v53, %v2182_v52 }
 0x250   :  { %1626 = dma.vmem_to_hbm [thread:$0]  %s1622_s25, 64, %s1624_s4, [#allocation3]  }
 0x253   :  { %v815_v57 = vpop.f32.mrf.mxu1 }
 0x254   :  { %v816_v58 = vadd.f32 %v2353_v55, %v815_v57  ;;  %v2184_v55 = vld [vmem:[%s3256_s8 + $0x1f8] sm:$0xf0]  ;;  %v2175_v57 = vor.u32 %v2344_v51, %v2174_v50 }
 0x255   :  { %v2187_v10 = vor.u32 %v2337_v54, %v2184_v55  ;;  %v3203_v55 = vld [vmem:[%s3257_s9 + $0x8] sm:$0xff] }
 0x256   :  { %v819_v0 = vmax.f32 %v816_v58, 0.0  ;;  %v2320_v58 = vld [vmem:[%s3256_s8 + $0x134] sm:$0xf]  ;;  %v897_v13 = vperm.slane %v3203_v55, 0  ;;  %v898_v14 = vperm.slane %v3203_v55, 1 }
 0x258   :  { %v2972_v3 = vpack.c.bf16 %v819_v0, %v819_v0  ;;  %v2329_v0 = vld [vmem:[%s3256_s8 + $0x174] sm:$0xf0] }
 0x25a   :  { %2188 = vmatmul.msk.bf16.vlgmr.msra.gmra.mxu2 %vm730_vm0, %v2972_v3  ;;  %2189 = vmatmul.msk.bf16.vlgmr.msra.gmra.mxu3 %vm730_vm0, %v2972_v3 }
 0x25b   :  { %2190 = vmatmul.msk.bf16.vlgmr.msrb.gmra.mxu0 %vm730_vm0, %v2972_v3  ;;  %2191 = vmatmul.msk.bf16.vlgmr.msrb.gmra.mxu1 %vm730_vm0, %v2972_v3  ;;  %v817_v18 = vpop.f32.mrf.mxu1 }
 0x25c   :  { %1365 = vmatpush.bf16.msra.mxu3 %v2163_v4  ;;  %1352 = vmatpush.bf16.msra.mxu2 %v2159_v5  ;;  %v2115_v4 = vor.u32 %v2320_v58, %v2112_v59  ;;  %v2111_v5 = vor.u32 %v2328_v62, %v2110_v61  ;;  %v2051_v18 = vor.u32 %v2304_v6, %v2048_v7  ;;  %v900_v61 = vperm.slane %v3203_v55, 3 }
 0x25d   :  { %1378 = vmatpush.bf16.msrb.mxu0 %v2167_v8  ;;  %1391 = vmatpush.bf16.msrb.mxu1 %v2171_v9  ;;  %v2119_v8 = vor.u32 %v2329_v0, %v2118_v63  ;;  %v2123_v9 = vor.u32 %v2321_v1, %v2120_v2 }
 0x260   :  { %1366 = vmatpush.bf16.msra.mxu3 %v2099_v19  ;;  %1353 = vmatpush.bf16.msra.mxu2 %v2095_v20  ;;  %v2047_v19 = vor.u32 %v2312_v12, %v2046_v11  ;;  %v2288_v20 = vld [vmem:[%s3256_s8 + $0x34] sm:$0xf] }
 0x261   :  { %1379 = vmatpush.bf16.msrb.mxu0 %v2103_v23  ;;  %1392 = vmatpush.bf16.msrb.mxu1 %v2107_v24  ;;  %v2059_v23 = vor.u32 %v2305_v15, %v2056_v17  ;;  %v1982_v24 = vld [vmem:[%s3256_s8 + $0x30] sm:$0xf]  ;;  %v1987_v30 = vor.u32 %v2288_v20, %v1984_v21 }
 0x264   :  { %1367 = vmatpush.bf16.msra.mxu3 %v2035_v31  ;;  %1354 = vmatpush.bf16.msra.mxu2 %v2031_v32  ;;  %v1983_v31 = vor.u32 %v2296_v25, %v1982_v24  ;;  %v1991_v32 = vor.u32 %v2297_v27, %v1990_v26 }
 0x265   :  { %1380 = vmatpush.bf16.msrb.mxu0 %v2039_v36  ;;  %1393 = vmatpush.bf16.msrb.mxu1 %v2043_v37  ;;  %v1456_v36 = vld.sshfl [vmem:[#allocation1 + $0x8] sm:$0xff pattern:$0x73625140]  ;;  %v1458_v37 = vld.sshfl [vmem:[#allocation1 + $0x18] sm:$0xff pattern:$0x73625140] }
 0x266   :  { %1472 = vst [vmem:[#allocation1 + $0x1] ss:$4 sm:$0xff] %v2540_v16 }
 0x268   :  { %1368 = vmatpush.bf16.msra.mxu3 %v1971_v44  ;;  %1355 = vmatpush.bf16.msra.mxu2 %v1967_v45 }
 0x269   :  { %1381 = vmatpush.bf16.msrb.mxu0 %v1975_v48  ;;  %1394 = vmatpush.bf16.msrb.mxu1 %v1979_v49 }
 0x26a   :  { %2192 = vmatmul.msk.bf16.vlgmr.msrb.gmra.mxu2 %vm730_vm0, %v2972_v3  ;;  %2193 = vmatmul.msk.bf16.vlgmr.msrb.gmra.mxu3 %vm730_vm0, %v2972_v3 }
 0x26b   :  { %2194 = vmatmul.msk.bf16.vlgmr.msra.gmra.mxu0 %vm730_vm0, %v2972_v3  ;;  %2195 = vmatmul.msk.bf16.vlgmr.msra.gmra.mxu1 %vm730_vm0, %v2972_v3 }
 0x26c   :  { %1417 = vmatpush.bf16.msrb.mxu3 %v2179_v56  ;;  %1404 = vmatpush.bf16.msrb.mxu2 %v2175_v57 }
 0x26d   :  { %1430 = vmatpush.bf16.msra.mxu0 %v2183_v60  ;;  %1443 = vmatpush.bf16.msra.mxu1 %v2187_v10  ;;  %v1477_v57 = vld.sshfl [vmem:[#allocation1 + $0x10] sm:$0xff pattern:$0x73625140]  ;;  %v899_v10 = vperm.slane %v3203_v55, 2 }
 0x26e   :  { %v1478_v63 = vld.sshfl [vmem:[#allocation1 + $0x18] sm:$0xff pattern:$0x73625140]  ;;  %v1493_v1 = vsel %vm753_vm1, %v1457_v38, %v1477_v57  ;;  %v1475_v7 = vld.sshfl [vmem:[#allocation1] sm:$0xff pattern:$0x73625140] }
 0x26f   :  { %v1494_v11 = vsel %vm753_vm1, %v1458_v37, %v1478_v63  ;;  %v1476_v12 = vld.sshfl [vmem:[#allocation1 + $0x8] sm:$0xff pattern:$0x73625140]  ;;  %v1491_v20 = vsel %vm753_vm1, %v1455_v35, %v1475_v7  ;;  %v903_v63 = vperm.slane %v3203_v55, 6 }
 0x270   :  { %1418 = vmatpush.bf16.msrb.mxu3 %v2115_v4  ;;  %1405 = vmatpush.bf16.msrb.mxu2 %v2111_v5 }
 0x271   :  { %1431 = vmatpush.bf16.msra.mxu0 %v2119_v8  ;;  %1444 = vmatpush.bf16.msra.mxu1 %v2123_v9 }
 0x274   :  { %1419 = vmatpush.bf16.msrb.mxu3 %v2051_v18  ;;  %1406 = vmatpush.bf16.msrb.mxu2 %v2047_v19 }
 0x275   :  { %1432 = vmatpush.bf16.msra.mxu0 %v2055_v22  ;;  %1445 = vmatpush.bf16.msra.mxu1 %v2059_v23  ;;  %v1492_v23 = vsel %vm753_vm1, %v1456_v36, %v1476_v12 }
 0x278   :  { %1420 = vmatpush.bf16.msrb.mxu3 %v1987_v30  ;;  %1407 = vmatpush.bf16.msrb.mxu2 %v1983_v31 }
 0x279   :  { %1433 = vmatpush.bf16.msra.mxu0 %v1991_v32  ;;  %1446 = vmatpush.bf16.msra.mxu1 %v1995_v34 }
 0x27a   :  { %2196 = vmatmul.msk.bf16.vlgmr.msra.gmra.mxu2 %vm730_vm0, %v2972_v3  ;;  %2197 = vmatmul.msk.bf16.vlgmr.msra.gmra.mxu3 %vm730_vm0, %v2972_v3 }
 0x27b   :  { %2198 = vmatmul.msk.bf16.vlgmr.msrb.gmra.mxu0 %vm730_vm0, %v2972_v3  ;;  %2199 = vmatmul.msk.bf16.vlgmr.msrb.gmra.mxu1 %vm730_vm0, %v2972_v3 }
 0x28a   :  { %2200 = vmatmul.msk.bf16.vlgmr.msrb.gmra.mxu2 %vm730_vm0, %v2972_v3  ;;  %2201 = vmatmul.msk.bf16.vlgmr.msrb.gmra.mxu3 %vm730_vm0, %v2972_v3 }
 0x28b   :  { %2202 = vmatmul.msk.bf16.vlgmr.msra.gmra.mxu0 %vm730_vm0, %v2972_v3  ;;  %2203 = vmatmul.msk.bf16.vlgmr.msra.gmra.mxu1 %vm730_vm0, %v2972_v3  ;;  %v3182_v3 = vld.sshfl [vmem:[#allocation1 + $0x30] sm:$0xff pattern:$0x73625140] }
 0x28c   :  { %1474 = vst [vmem:[#allocation1 + $0x21] ss:$4 sm:$0xff] %v2583_v33  ;;  %v3198_v33 = vld [vmem:[%s3257_s9] sm:$0xff]  ;;  %s2428_s9 = smov [#allocation4]  }
 0x28d   :  { %v891_v56 = vperm.slane %v3198_v33, 2  ;;  %v892_v58 = vperm.slane %v3198_v33, 3  ;;  %v889_v0 = vperm.slane %v3198_v33, 0  ;;  %v890_v2 = vperm.slane %v3198_v33, 1  ;;  %s1632_s6 = sshll.u32 %s2428_s9, 4  ;;  %s1633_s6 = int_to_ptr.vmem [resolvable:$true] %s1632_s6 }
 0x28e   :  { %v895_v28 = vperm.slane %v3198_v33, 6  ;;  %v896_v37 = vperm.slane %v3198_v33, 7 }
 0x293   :  { %v1481_v34 = vld.sshfl [vmem:[#allocation1 + $0x30] sm:$0xff pattern:$0x73625140]  ;;  %v1482_v38 = vld.sshfl [vmem:[#allocation1 + $0x38] sm:$0xff pattern:$0x73625140] }
 0x2d8   :  { %v1279_v42 = vpop.f32.mrf.mxu0  ;;  %v1292_v43 = vpop.f32.mrf.mxu1 }
 0x2d9   :  { %v1280_v62 = vadd.f32 %v1279_v42, %v891_v56  ;;  %v1293_v6 = vadd.f32 %v1292_v43, %v892_v58 }
 0x2db   :  { %v1501_v15 = vsub.f32 %v1493_v1, %v1280_v62  ;;  %v1502_v22 = vsub.f32 %v1494_v11, %v1293_v6  ;;  %v893_v1 = vperm.slane %v3198_v33, 4 }
 0x2dd   :  { %v1253_v44 = vpop.f32.mrf.mxu2  ;;  %v1266_v45 = vpop.f32.mrf.mxu3  ;;  %v1509_v31 = vmul.f32 -0.5, %v1501_v15 }
 0x2de   :  { %v1254_v17 = vadd.f32 %v1253_v44, %v889_v0  ;;  %v1267_v21 = vadd.f32 %v1266_v45, %v890_v2  ;;  %v1510_v45 = vmul.f32 -0.5, %v1502_v22  ;;  %v904_v0 = vperm.slane %v3203_v55, 7 }
 0x2e0   :  { %v1281_v46 = vpop.f32.mrf.mxu0  ;;  %v1294_v47 = vpop.f32.mrf.mxu1  ;;  %v1499_v32 = vsub.f32 %v1491_v20, %v1254_v17  ;;  %v1500_v35 = vsub.f32 %v1492_v23, %v1267_v21  ;;  %v901_v21 = vperm.slane %v3203_v55, 4 }
 0x2e2   :  { %v1508_v56 = vmul.f32 -0.5, %v1500_v35 }
 0x2e4   :  { %v1516_v7 = vmul.f32 %v1508_v56, %v1500_v35 }
 0x2e5   :  { %v1255_v48 = vpop.f32.mrf.mxu2  ;;  %v1268_v49 = vpop.f32.mrf.mxu3 }
 0x2e6   :  { %v1517_v48 = vmul.f32 %v1509_v31, %v1501_v15  ;;  %v1507_v49 = vmul.f32 -0.5, %v1499_v32 }
 0x2e8   :  { %v3187_v50 = vpop.f32.mrf.mxu0  ;;  %v3189_v16 = vpop.f32.mrf.mxu1  ;;  %v1515_v6 = vmul.f32 %v1507_v49, %v1499_v32 }
 0x2e9   :  { %v1332_v57 = vadd.f32 %v3187_v50, %v895_v28  ;;  %v1345_v58 = vadd.f32 %v3189_v16, %v896_v37 }
 0x2ed   :  { %v3191_v51 = vpop.f32.mrf.mxu2  ;;  %v3193_v52 = vpop.f32.mrf.mxu3 }
 0x2f0   :  { %v1333_v53 = vpop.f32.mrf.mxu0  ;;  %v1346_v54 = vpop.f32.mrf.mxu1 }
 0x2f1   :  { %v1497_v53 = vsel %vm753_vm1, %v3182_v3, %v1481_v34  ;;  %v1498_v54 = vsel %vm753_vm1, %v3184_v41, %v1482_v38  ;;  %v894_v41 = vperm.slane %v3198_v33, 5  ;;  %v1306_v33 = vadd.f32 %v3191_v51, %v893_v1 }
 0x2f2   :  { %v1505_v11 = vsub.f32 %v1497_v53, %v1332_v57  ;;  %v1506_v12 = vsub.f32 %v1498_v54, %v1345_v58 }
 0x2f5   :  { %v1307_v59 = vpop.f32.mrf.mxu2  ;;  %v1320_v60 = vpop.f32.mrf.mxu3 }
 0x2f6   :  { %v1479_v59 = vld.sshfl [vmem:[#allocation1 + $0x20] sm:$0xff pattern:$0x73625140] }
 0x2f7   :  { %v1495_v50 = vsel %vm753_vm1, %v3178_v39, %v1479_v59  ;;  %v902_v39 = vperm.slane %v3203_v55, 5 }
 0x2f8   :  { %v1383_v4 = vpop.f32.mrf.mxu0  ;;  %v1396_v5 = vpop.f32.mrf.mxu1  ;;  %v1503_v49 = vsub.f32 %v1495_v50, %v1306_v33 }
 0x2f9   :  { %v1384_v8 = vadd.f32 %v1383_v4, %v899_v10  ;;  %v1397_v9 = vadd.f32 %v1396_v5, %v900_v61  ;;  %v1518_v10 = vmul.f32 %v1510_v45, %v1502_v22 }
 0x2fb   :  { %v1525_v18 = vsub.f32 0.0, %v1384_v8  ;;  %v1526_v19 = vsub.f32 0.0, %v1397_v9  ;;  %v1557_v16 = vmul.f32 0.5, %v1384_v8  ;;  %v1558_v5 = vmul.f32 0.5, %v1397_v9 }
 0x2fd   :  { %v1535_v24 = vmul.f32 1.442695, %v1525_v18  ;;  %v1537_v25 = vmul.f32 1.442695, %v1526_v19  ;;  %v1357_v26 = vpop.f32.mrf.mxu2  ;;  %v1370_v27 = vpop.f32.mrf.mxu3 }
 0x2fe   :  { %v1358_v29 = vadd.f32 %v1357_v26, %v897_v13  ;;  %v3218_v30 = vadd.f32 %v1370_v27, %v898_v14  ;;  %v1480_v26 = vld.sshfl [vmem:[#allocation1 + $0x28] sm:$0xff pattern:$0x73625140] }
 0x2ff   :  { %2356 = vpow2.f32 %v1535_v24 }
 0x300   :  { %2358 = vpow2.f32 %v1537_v25  ;;  %v1523_v42 = vsub.f32 0.0, %v1358_v29  ;;  %v1524_v36 = vsub.f32 0.0, %v3218_v30  ;;  %v1385_v43 = vpop.f32.mrf.mxu0  ;;  %v1398_v44 = vpop.f32.mrf.mxu1  ;;  %v1555_v23 = vmul.f32 0.5, %v1358_v29 }
 0x301   :  { %v1319_v25 = vadd.f32 %v3193_v52, %v894_v41  ;;  %v1556_v28 = vmul.f32 0.5, %v3218_v30  ;;  %v1496_v29 = vsel %vm753_vm1, %v3180_v40, %v1480_v26  ;;  %v1513_v44 = vmul.f32 -0.5, %v1505_v11 }
 0x302   :  { %v1531_v46 = vmul.f32 1.442695, %v1523_v42  ;;  %v1533_v47 = vmul.f32 1.442695, %v1524_v36 }
 0x303   :  { %v1504_v54 = vsub.f32 %v1496_v29, %v1319_v25 }
 0x304   :  { %2360 = vpow2.f32 %v1531_v46 }
 0x305   :  { %v2357_v60 = vpop.eup %2356  ;;  %2362 = vpow2.f32 %v1533_v47  ;;  %v1359_v61 = vpop.f32.mrf.mxu2  ;;  %v1512_v1 = vmul.f32 -0.5, %v1504_v54 }
 0x306   :  { %v1372_v62 = vpop.f32.mrf.mxu3  ;;  %v2359_v3 = vpop.eup %2358  ;;  %v1549_v2 = vmul.f32 %v2357_v60, %v1517_v48  ;;  %v1514_v48 = vmul.f32 -0.5, %v1506_v12  ;;  %v1521_v60 = vmul.f32 %v1513_v44, %v1505_v11 }
 0x307   :  { %v1550_v4 = vmul.f32 %v2359_v3, %v1518_v10  ;;  %v1511_v62 = vmul.f32 -0.5, %v1503_v49  ;;  %v1520_v11 = vmul.f32 %v1512_v1, %v1504_v54 }
 0x308   :  { %v1435_v13 = vpop.f32.mrf.mxu0  ;;  %v1448_v14 = vpop.f32.mrf.mxu1  ;;  %v1565_v15 = vsub.f32 %v1549_v2, %v1557_v16  ;;  %v1522_v61 = vmul.f32 %v1514_v48, %v1506_v12 }
 0x309   :  { %v1566_v17 = vsub.f32 %v1550_v4, %v1558_v5  ;;  %v1436_v18 = vadd.f32 %v1435_v13, %v903_v63  ;;  %v1449_v19 = vadd.f32 %v1448_v14, %v904_v0  ;;  %v1519_v4 = vmul.f32 %v1511_v62, %v1503_v49 }
 0x30a   :  { %v2361_v20 = vpop.eup %2360  ;;  %v2206_v32 = vadd.f32 -0.9189385, %v1565_v15 }
 0x30b   :  { %v2363_v8 = vpop.eup %2362  ;;  %v2207_v9 = vadd.f32 -0.9189385, %v1566_v17  ;;  %v1547_v22 = vmul.f32 %v2361_v20, %v1515_v6  ;;  %v1529_v24 = vsub.f32 0.0, %v1436_v18  ;;  %v1530_v31 = vsub.f32 0.0, %v1449_v19 }
 0x30c   :  { %v1548_v27 = vmul.f32 %v2363_v8, %v1516_v7  ;;  %v1561_v2 = vmul.f32 0.5, %v1436_v18  ;;  %v1562_v16 = vmul.f32 0.5, %v1449_v19 }
 0x30d   :  { %v1588_v34 = vrot.slane %v2207_v9, 4  ;;  %v1563_v51 = vsub.f32 %v1547_v22, %v1555_v23  ;;  %v1543_v37 = vmul.f32 1.442695, %v1529_v24  ;;  %v1409_v35 = vpop.f32.mrf.mxu2  ;;  %v1545_v55 = vmul.f32 1.442695, %v1530_v31 }
 0x30e   :  { %v1422_v38 = vpop.f32.mrf.mxu3  ;;  %v1564_v42 = vsub.f32 %v1548_v27, %v1556_v28  ;;  %v1410_v36 = vadd.f32 %v1409_v35, %v901_v21 }
 0x30f   :  { %v1423_v43 = vadd.f32 %v1422_v38, %v902_v39  ;;  %v1593_v52 = vsel %vm1591_vm4, %v2206_v32, %v1588_v34  ;;  %2364 = vpow2.f32 %v1543_v37  ;;  %v2204_v56 = vadd.f32 -0.9189385, %v1563_v51 }
 0x310   :  { %1601 = vst [vmem:[#allocation4 + $0x8] sm:$0xff] %v1593_v52  ;;  %v2205_v30 = vadd.f32 -0.9189385, %v1564_v42  ;;  %2366 = vpow2.f32 %v1545_v55  ;;  %v1527_v45 = vsub.f32 0.0, %v1410_v36  ;;  %v1437_v46 = vpop.f32.mrf.mxu0  ;;  %v1450_v47 = vpop.f32.mrf.mxu1  ;;  %v1559_v12 = vmul.f32 0.5, %v1410_v36 }
 0x311   :  { %v1528_v53 = vsub.f32 0.0, %v1423_v43  ;;  %v1560_v20 = vmul.f32 0.5, %v1423_v43 }
 0x312   :  { %v1587_v57 = vrot.slane %v2205_v30, 4  ;;  %v1539_v58 = vmul.f32 1.442695, %v1527_v45 }
 0x313   :  { %v1541_v59 = vmul.f32 1.442695, %v1528_v53 }
 0x314   :  { %v1592_v40 = vsel %vm1591_vm4, %v2204_v56, %v1587_v57  ;;  %2368 = vpow2.f32 %v1539_v58 }
 0x315   :  { %v2365_v10 = vpop.eup %2364  ;;  %1600 = vst [vmem:[#allocation4] sm:$0xff] %v1592_v40  ;;  %2370 = vpow2.f32 %v1541_v59  ;;  %v1411_v63 = vpop.f32.mrf.mxu2 }
 0x316   :  { %v1424_v0 = vpop.f32.mrf.mxu3  ;;  %v2367_v3 = vpop.eup %2366  ;;  %v1553_v41 = vmul.f32 %v2365_v10, %v1521_v60 }
 0x317   :  { %v1554_v50 = vmul.f32 %v2367_v3, %v1522_v61 }
 0x318   :  { %v1569_v5 = vsub.f32 %v1553_v41, %v1561_v2 }
 0x319   :  { %v1570_v6 = vsub.f32 %v1554_v50, %v1562_v16 }
 0x31a   :  { %v2369_v7 = vpop.eup %2368  ;;  %v2210_v33 = vadd.f32 -0.9189385, %v1569_v5 }
 0x31b   :  { %v2371_v13 = vpop.eup %2370  ;;  %v2211_v14 = vadd.f32 -0.9189385, %v1570_v6  ;;  %v1551_v15 = vmul.f32 %v2369_v7, %v1519_v4 }
 0x31c   :  { %v1552_v17 = vmul.f32 %v2371_v13, %v1520_v11 }
 0x31d   :  { %v1590_v21 = vrot.slane %v2211_v14, 4  ;;  %v1567_v39 = vsub.f32 %v1551_v15, %v1559_v12 }
 0x31e   :  { %v1568_v8 = vsub.f32 %v1552_v17, %v1560_v20 }
 0x31f   :  { %v1595_v9 = vsel %vm1591_vm4, %v2210_v33, %v1590_v21  ;;  %v2208_v19 = vadd.f32 -0.9189385, %v1567_v39 }
 0x320   :  { %1603 = vst [vmem:[#allocation4 + $0x18] sm:$0xff] %v1595_v9  ;;  %v2209_v18 = vadd.f32 -0.9189385, %v1568_v8 }
 0x322   :  { %v1589_v22 = vrot.slane %v2209_v18, 4 }
 0x324   :  { %v1594_v23 = vsel %vm1591_vm4, %v2208_v19, %v1589_v22 }
 0x325   :  { %1602 = vst [vmem:[#allocation4 + $0x10] sm:$0xff] %v1594_v23 }
 0x326   :  { %1637 = dma.vmem_to_hbm [thread:$0]  %s1633_s6, 512, %s1635_s29, [#allocation5]  }
 0x327   :  { %2420 = dma.done.wait [#allocation3], 64  }
 0x328   :  { %2421 = vsyncadd [#allocation3], 4294967232 }
 0x329   :  { %2422 = dma.done.wait [#allocation5], 512  }
 0x32a   :  { %2423 = vsyncadd [#allocation5], 4294966784 }
 0x32b   :  { %1646 = vsyncpa [#allocation3], 1 }
 0x32c   :  { %1647 = vsyncpa [#allocation5], 1 }

</bundles_post_ra>
